<compile_context>
chip_gen: v6e
topology: v6e:2x2x1
jax: 0.10.0
libtpu: 0.0.40
codegen_flags: <defaults>
</compile_context>

<pallas_src>
import functools

import jax
import jax.numpy as jnp
from jax.experimental import pallas as pl
from jax.experimental.pallas import tpu as pltpu


def _round_up(x, m):
    return (x + m - 1) // m * m


def _is_statically_zero(a):
    """True iff `a` is a concrete array that is identically zero."""
    try:
        return not bool(jnp.any(a != 0))
    except Exception:  # traced value -> cannot decide statically, keep generic path
        return False


def _stage_kernel(*refs, h, w, wp, cin, cp8, apply_relu, has_mask, has_res, eps):
    """ReflectionPad -> DeformableConv2d(zero offsets) -> InstanceNorm [-> ReLU] [+res].

    refs (in order):
      xflat_ref : (1, Cin, Lp)  reflect-padded input, flattened as q = i*Wp + j
      wreg_ref  : (Cout, 9*Cp8) regular conv weights, column = tap*Cp8 + cin
      breg_ref  : (Cout, 1)     regular conv bias
      vmask_ref : (1, Lp)       1.0 at real output pixels, 0.0 at junk columns
      [wmod_ref : (9, 9*Cp8), bmod_ref : (9, 1)]  modulator conv (only if nonzero)
      [res_ref  : (1, Cin, Lp)] padded-flat residual (the block input x)
      out_ref   : (1, Cout, Lp)
      patch_ref : (9*Cp8, Lp)   VMEM scratch: fused-K im2col slab
    """
    idx = 0
    xflat_ref = refs[idx]; idx += 1
    wreg_ref = refs[idx]; idx += 1
    breg_ref = refs[idx]; idx += 1
    vmask_ref = refs[idx]; idx += 1
    if has_mask:
        wmod_ref, bmod_ref = refs[idx], refs[idx + 1]; idx += 2
    if has_res:
        res_ref = refs[idx]; idx += 1
    out_ref = refs[idx]; idx += 1
    patch_ref = refs[idx]

    lp = xflat_ref.shape[-1]
    xf = xflat_ref[0]                                          # (Cin, Lp) f32

    if cin != cp8:
        # zero the Cp8-padding rows so they contribute 0 to the K contraction
        patch_ref[...] = jnp.zeros_like(patch_ref)

    # Build the 9 conv taps in-kernel: tap (kh, kw) of the padded image is a pure
    # lane shift by kh*Wp + kw of the flattened slab.  Junk columns (j >= W or
    # i >= H) are produced too; they are masked out of the statistics below and
    # dropped by the host when un-flattening.
    for kh in range(3):
        for kw in range(3):
            k = kh * 3 + kw
            off = kh * wp + kw
            sk = pltpu.roll(xf, shift=lp - off, axis=1) if off else xf
            patch_ref[k * cp8:k * cp8 + cin, :] = sk

    if has_mask:
        # Generic modulator path (only compiled when its params are nonzero):
        # mask = 2*sigmoid(conv3x3(x)), applied per tap before the regular conv.
        logits = jnp.dot(wmod_ref[...], patch_ref[...],
                         preferred_element_type=jnp.float32) + bmod_ref[...]
        mask = 2.0 * pl.reciprocal(1.0 + jnp.exp(-logits), approx=True)  # (9, Lp)
        for k in range(9):
            patch_ref[k * cp8:(k + 1) * cp8, :] = (
                patch_ref[k * cp8:(k + 1) * cp8, :] * mask[k:k + 1, :])

    # Deformable conv with zero offsets == (masked) regular conv, fused into ONE
    # MXU matmul with K = 9*Cp8 (bf16 operands, f32 accumulation).
    lhs = wreg_ref[...]                                        # (Cout, 9*Cp8)
    rhs = patch_ref[...].astype(lhs.dtype)                     # (9*Cp8, Lp)
    y = jnp.dot(lhs, rhs, preferred_element_type=jnp.float32) + breg_ref[...]

    # InstanceNorm2d (affine=False, biased variance) over real pixels only,
    # single pass: var = E[y^2] - mean^2.
    vf = vmask_ref[...]                                        # (1, Lp)
    inv_n = 1.0 / float(h * w)
    s1 = jnp.sum(y * vf, axis=1, keepdims=True)
    s2 = jnp.sum(y * y * vf, axis=1, keepdims=True)
    mean = s1 * inv_n
    var = jnp.maximum(s2 * inv_n - mean * mean, 0.0)
    y = (y - mean) * jax.lax.rsqrt(var + eps)

    if apply_relu:
        y = jnp.maximum(y, 0.0)
    if has_res:
        # Residual arrives in the same padded-flat layout; its value at output
        # pixel (i, j) is the centre tap, i.e. a lane shift by Wp + 1.
        y = y + pltpu.roll(res_ref[0], shift=lp - (wp + 1), axis=1)
    out_ref[0] = y.astype(out_ref.dtype)


def _deform_stage(x, w_mod, b_mod, w_reg, b_reg, residual_flat, apply_relu,
                  use_bf16=True):
    """One stage: ReflectionPad2d(1) -> DeformableConv2d -> InstanceNorm2d [-> ReLU] [+res]."""
    n, c, h, w = x.shape
    hp, wp = h + 2, w + 2
    flat = hp * wp
    lp = _round_up(flat, 128)           # lane-dense slabs
    cp8 = _round_up(c, 8)               # sublane-aligned per-tap channel slot

    # Host glue (layout plumbing only): reflect pad + flatten -> ~1.3x the input
    # instead of the 9x im2col blow-up.  Tap extraction happens in-kernel.
    xp = jnp.pad(x, ((0, 0), (0, 0), (1, 1), (1, 1)), mode="reflect")
    xflat = jnp.pad(xp.reshape(n, c, flat), ((0, 0), (0, 0), (0, lp - flat)))

    def flat_w(wt, rows):
        # (rows, C, 3, 3) -> (rows, 9*Cp8), column index = (kh*3+kw)*Cp8 + cin
        wt = jnp.transpose(wt, (0, 2, 3, 1))
        wt = jnp.pad(wt, ((0, 0), (0, 0), (0, 0), (0, cp8 - c)))
        return wt.reshape(rows, 9 * cp8)

    mm_dtype = jnp.bfloat16 if use_bf16 else jnp.float32
    wreg_f = flat_w(w_reg, c).astype(mm_dtype)
    breg_f = b_reg.reshape(c, 1).astype(jnp.float32)

    # valid-pixel mask over the padded-width flattened axis (q = i*Wp + j)
    q = jnp.arange(lp)
    vmask = ((q % wp < w) & (q < h * wp)).astype(jnp.float32).reshape(1, lp)

    # The module constant-initializes the modulator conv to zero => mask == 1.0;
    # skip that whole path (matmul, sigmoid, scaling and its DMAs) statically.
    has_mask = not (_is_statically_zero(w_mod) and _is_statically_zero(b_mod))
    has_res = residual_flat is not None

    kernel = functools.partial(
        _stage_kernel, h=h, w=w, wp=wp, cin=c, cp8=cp8,
        apply_relu=apply_relu, has_mask=has_mask, has_res=has_res, eps=1e-5)

    inputs = [xflat, wreg_f, breg_f, vmask]
    in_specs = [
        pl.BlockSpec((1, c, lp), lambda i: (i, 0, 0)),
        pl.BlockSpec((c, 9 * cp8), lambda i: (0, 0)),
        pl.BlockSpec((c, 1), lambda i: (0, 0)),
        pl.BlockSpec((1, lp), lambda i: (0, 0)),
    ]
    if has_mask:
        inputs += [flat_w(w_mod, 9).astype(jnp.float32),
                   b_mod.reshape(9, 1).astype(jnp.float32)]
        in_specs += [pl.BlockSpec((9, 9 * cp8), lambda i: (0, 0)),
                     pl.BlockSpec((9, 1), lambda i: (0, 0))]
    if has_res:
        inputs.append(residual_flat)
        in_specs.append(pl.BlockSpec((1, c, lp), lambda i: (i, 0, 0)))

    # Explicit VMEM budget: double-buffered I/O blocks + patches scratch (+ headroom),
    # clamped to v7x's 64 MiB physical VMEM.
    io_bytes = 4 * c * lp * (2 + (1 if has_res else 0))
    scratch_bytes = 4 * 9 * cp8 * lp
    vmem_limit = int(min(max(2 * (io_bytes + scratch_bytes) + (4 << 20), 16 << 20),
                         64 << 20))

    out = pl.pallas_call(
        kernel,
        out_shape=jax.ShapeDtypeStruct((n, c, lp), jnp.float32),
        grid=(n,),
        in_specs=in_specs,
        out_specs=pl.BlockSpec((1, c, lp), lambda i: (i, 0, 0)),
        scratch_shapes=[pltpu.VMEM((9 * cp8, lp), jnp.float32)],
        compiler_params=pltpu.CompilerParams(
            dimension_semantics=("parallel",),   # megacore: batch items across TCs
            vmem_limit_bytes=vmem_limit),
    )(*inputs)

    # un-flatten: drop the padded-width junk columns and the lane-pad tail
    out_img = out[:, :, :flat].reshape(n, c, hp, wp)[:, :, :h, :w]
    return out_img, xflat


def deformable_resnet_block(x, params):
    """out = x + conv_block(x); conv_block = pad,dconv,IN,ReLU,pad,dconv,IN."""
    h1, xflat = _deform_stage(x, params["w_mod1"], params["b_mod1"],
                              params["w_reg1"], params["b_reg1"],
                              residual_flat=None, apply_relu=True)
    out, _ = _deform_stage(h1, params["w_mod2"], params["b_mod2"],
                           params["w_reg2"], params["b_reg2"],
                           residual_flat=xflat, apply_relu=False)
    return out


def reference_block(x, params):
    """Pure-JAX reference (offsets==0 and mask==1 because mod/offset convs are zero-init)."""
    def stage(inp, w_reg, b_reg, relu):
        xp = jnp.pad(inp, ((0, 0), (0, 0), (1, 1), (1, 1)), mode="reflect")
        y = jax.lax.conv_general_dilated(
            xp, w_reg, (1, 1), "VALID",
            dimension_numbers=("NCHW", "OIHW", "NCHW"))
        y = y + b_reg.reshape(1, -1, 1, 1)
        mean = y.mean(axis=(2, 3), keepdims=True)
        var = ((y - mean) ** 2).mean(axis=(2, 3), keepdims=True)
        y = (y - mean) * jax.lax.rsqrt(var + 1e-5)
        return jnp.maximum(y, 0.0) if relu else y

    h = stage(x, params["w_reg1"], params["b_reg1"], True)
    return x + stage(h, params["w_reg2"], params["b_reg2"], False)


if __name__ == "__main__":
    key = jax.random.PRNGKey(0)
    N, C, H, W = 2, 4, 16, 16  # dim = 4
    kx, k1, k2, k3, k4 = jax.random.split(key, 5)
    x = jax.random.normal(kx, (N, C, H, W), jnp.float32)

    def conv_w(k, o, i):
        bound = 1.0 / float(i * 9) ** 0.5  # kaiming-uniform-like, deterministic
        return jax.random.uniform(k, (o, i, 3, 3), jnp.float32, -bound, bound)

    params = dict(
        # DeformableConv2d #1: modulator/offset convs are constant-initialized to 0
        w_mod1=jnp.zeros((9, C, 3, 3), jnp.float32),
        b_mod1=jnp.zeros((9,), jnp.float32),
        w_reg1=conv_w(k1, C, C),
        b_reg1=jax.random.uniform(k2, (C,), jnp.float32, -0.1, 0.1),
        # DeformableConv2d #2
        w_mod2=jnp.zeros((9, C, 3, 3), jnp.float32),
        b_mod2=jnp.zeros((9,), jnp.float32),
        w_reg2=conv_w(k3, C, C),
        b_reg2=jax.random.uniform(k4, (C,), jnp.float32, -0.1, 0.1),
    )

    out = jax.block_until_ready(deformable_resnet_block(x, params))
    ref = jax.block_until_ready(reference_block(x, params))

    assert out.shape == x.shape and out.dtype == x.dtype
    # tolerance sized for bf16 MXU operands (f32 accumulation), per perf guidance
    if not bool(jnp.allclose(out, ref, atol=3e-2, rtol=3e-2)):
        raise SystemExit(
            f"mismatch vs reference, max abs err = {float(jnp.max(jnp.abs(out - ref)))}")
    print("KERNEL_OK")
</pallas_src>

<mosaic_0001>
module attributes {stable_mosaic.version = 11 : i64} {
  func.func @_stage_kernel(%arg0: i32, %arg1: memref<1x4x384xf32, #tpu.memory_space<vmem>>, %arg2: memref<4x72xbf16, #tpu.memory_space<vmem>>, %arg3: memref<4x1xf32, #tpu.memory_space<vmem>>, %arg4: memref<1x384xf32, #tpu.memory_space<vmem>>, %arg5: memref<1x4x384xf32, #tpu.memory_space<vmem>>, %arg6: memref<72x384xf32, #tpu.memory_space<vmem>>) attributes {dimension_semantics = [#tpu.dimension_semantics<parallel>], iteration_bounds = array<i64: 2>, scalar_prefetch = 0 : i64, scratch_operands = 1 : i64, tpu.core_type = #tpu.core_type<tc>, window_params = [{transform_indices = @transform_0, window_bounds = array<i64: 1, 4, 384>}, {pipeline_mode = #tpu.pipeline_mode<synchronous>, transform_indices = @transform_1, window_bounds = array<i64: 4, 72>}, {pipeline_mode = #tpu.pipeline_mode<synchronous>, transform_indices = @transform_2, window_bounds = array<i64: 4, 1>}, {pipeline_mode = #tpu.pipeline_mode<synchronous>, transform_indices = @transform_3, window_bounds = array<i64: 1, 384>}, {transform_indices = @transform_4, window_bounds = array<i64: 1, 4, 384>}]} {
    %c0 = arith.constant 0 : index
    %c0_0 = arith.constant 0 : index
    %c0_1 = arith.constant 0 : index
    %0 = vector.load %arg1[%c0, %c0_0, %c0_1] : memref<1x4x384xf32, #tpu.memory_space<vmem>>, vector<1x4x384xf32>
    %1 = vector.shape_cast %0 : vector<1x4x384xf32> to vector<4x384xf32>
    %cst = arith.constant 0.000000e+00 : f32
    %2 = vector.broadcast %cst : f32 to vector<72x384xf32>
    %c0_2 = arith.constant 0 : index
    %c0_3 = arith.constant 0 : index
    %3 = vector.load %arg6[%c0_2, %c0_3] : memref<72x384xf32, #tpu.memory_space<vmem>>, vector<72x384xf32>
    tpu.vector_store %arg6[%c0_2, %c0_3], %2 {strides = array<i32>} : memref<72x384xf32, #tpu.memory_space<vmem>>, vector<72x384xf32>,
    %c0_4 = arith.constant 0 : index
    %c0_5 = arith.constant 0 : index
    %4 = vector.load %arg6[%c0_4, %c0_5] : memref<72x384xf32, #tpu.memory_space<vmem>>, vector<4x384xf32>
    tpu.vector_store %arg6[%c0_4, %c0_5], %1 {strides = array<i32>} : memref<72x384xf32, #tpu.memory_space<vmem>>, vector<4x384xf32>,
    %c383_i32 = arith.constant 383 : i32
    %5 = tpu.dynamic_rotate %1 by %c383_i32 dim 1 : vector<4x384xf32>, i32 -> vector<4x384xf32>
    %c8 = arith.constant 8 : index
    %c0_6 = arith.constant 0 : index
    %6 = vector.load %arg6[%c8, %c0_6] : memref<72x384xf32, #tpu.memory_space<vmem>>, vector<4x384xf32>
    tpu.vector_store %arg6[%c8, %c0_6], %5 {strides = array<i32>} : memref<72x384xf32, #tpu.memory_space<vmem>>, vector<4x384xf32>,
    %c382_i32 = arith.constant 382 : i32
    %7 = tpu.dynamic_rotate %1 by %c382_i32 dim 1 : vector<4x384xf32>, i32 -> vector<4x384xf32>
    %c16 = arith.constant 16 : index
    %c0_7 = arith.constant 0 : index
    %8 = vector.load %arg6[%c16, %c0_7] : memref<72x384xf32, #tpu.memory_space<vmem>>, vector<4x384xf32>
    tpu.vector_store %arg6[%c16, %c0_7], %7 {strides = array<i32>} : memref<72x384xf32, #tpu.memory_space<vmem>>, vector<4x384xf32>,
    %c366_i32 = arith.constant 366 : i32
    %9 = tpu.dynamic_rotate %1 by %c366_i32 dim 1 : vector<4x384xf32>, i32 -> vector<4x384xf32>
    %c24 = arith.constant 24 : index
    %c0_8 = arith.constant 0 : index
    %10 = vector.load %arg6[%c24, %c0_8] : memref<72x384xf32, #tpu.memory_space<vmem>>, vector<4x384xf32>
    tpu.vector_store %arg6[%c24, %c0_8], %9 {strides = array<i32>} : memref<72x384xf32, #tpu.memory_space<vmem>>, vector<4x384xf32>,
    %c365_i32 = arith.constant 365 : i32
    %11 = tpu.dynamic_rotate %1 by %c365_i32 dim 1 : vector<4x384xf32>, i32 -> vector<4x384xf32>
    %c32 = arith.constant 32 : index
    %c0_9 = arith.constant 0 : index
    %12 = vector.load %arg6[%c32, %c0_9] : memref<72x384xf32, #tpu.memory_space<vmem>>, vector<4x384xf32>
    tpu.vector_store %arg6[%c32, %c0_9], %11 {strides = array<i32>} : memref<72x384xf32, #tpu.memory_space<vmem>>, vector<4x384xf32>,
    %c364_i32 = arith.constant 364 : i32
    %13 = tpu.dynamic_rotate %1 by %c364_i32 dim 1 : vector<4x384xf32>, i32 -> vector<4x384xf32>
    %c40 = arith.constant 40 : index
    %c0_10 = arith.constant 0 : index
    %14 = vector.load %arg6[%c40, %c0_10] : memref<72x384xf32, #tpu.memory_space<vmem>>, vector<4x384xf32>
    tpu.vector_store %arg6[%c40, %c0_10], %13 {strides = array<i32>} : memref<72x384xf32, #tpu.memory_space<vmem>>, vector<4x384xf32>,
    %c348_i32 = arith.constant 348 : i32
    %15 = tpu.dynamic_rotate %1 by %c348_i32 dim 1 : vector<4x384xf32>, i32 -> vector<4x384xf32>
    %c48 = arith.constant 48 : index
    %c0_11 = arith.constant 0 : index
    %16 = vector.load %arg6[%c48, %c0_11] : memref<72x384xf32, #tpu.memory_space<vmem>>, vector<4x384xf32>
    tpu.vector_store %arg6[%c48, %c0_11], %15 {strides = array<i32>} : memref<72x384xf32, #tpu.memory_space<vmem>>, vector<4x384xf32>,
    %c347_i32 = arith.constant 347 : i32
    %17 = tpu.dynamic_rotate %1 by %c347_i32 dim 1 : vector<4x384xf32>, i32 -> vector<4x384xf32>
    %c56 = arith.constant 56 : index
    %c0_12 = arith.constant 0 : index
    %18 = vector.load %arg6[%c56, %c0_12] : memref<72x384xf32, #tpu.memory_space<vmem>>, vector<4x384xf32>
    tpu.vector_store %arg6[%c56, %c0_12], %17 {strides = array<i32>} : memref<72x384xf32, #tpu.memory_space<vmem>>, vector<4x384xf32>,
    %c346_i32 = arith.constant 346 : i32
    %19 = tpu.dynamic_rotate %1 by %c346_i32 dim 1 : vector<4x384xf32>, i32 -> vector<4x384xf32>
    %c64 = arith.constant 64 : index
    %c0_13 = arith.constant 0 : index
    %20 = vector.load %arg6[%c64, %c0_13] : memref<72x384xf32, #tpu.memory_space<vmem>>, vector<4x384xf32>
    tpu.vector_store %arg6[%c64, %c0_13], %19 {strides = array<i32>} : memref<72x384xf32, #tpu.memory_space<vmem>>, vector<4x384xf32>,
    %c0_14 = arith.constant 0 : index
    %c0_15 = arith.constant 0 : index
    %21 = vector.load %arg2[%c0_14, %c0_15] : memref<4x72xbf16, #tpu.memory_space<vmem>>, vector<4x72xbf16>
    %c0_16 = arith.constant 0 : index
    %c0_17 = arith.constant 0 : index
    %22 = vector.load %arg6[%c0_16, %c0_17] : memref<72x384xf32, #tpu.memory_space<vmem>>, vector<72x384xf32>
    %23 = arith.truncf %22 : vector<72x384xf32> to vector<72x384xbf16>
    %cst_18 = arith.constant dense<0.000000e+00> : vector<4x384xf32>
    %24 = tpu.matmul %21, %23, %cst_18 {dimension_numbers = #tpu.dot_dimension_numbers<[1], [0], [0], [1], [0, 0, 1, 1], [], []>} : vector<4x72xbf16>, vector<72x384xbf16>, vector<4x384xf32> -> vector<4x384xf32>
    %c0_19 = arith.constant 0 : index
    %c0_20 = arith.constant 0 : index
    %25 = vector.load %arg3[%c0_19, %c0_20] : memref<4x1xf32, #tpu.memory_space<vmem>>, vector<4x1xf32>
    %26 = vector.broadcast %25 : vector<4x1xf32> to vector<4x384xf32>
    %27 = arith.addf %24, %26 : vector<4x384xf32>
    %c0_21 = arith.constant 0 : index
    %c0_22 = arith.constant 0 : index
    %28 = vector.load %arg4[%c0_21, %c0_22] : memref<1x384xf32, #tpu.memory_space<vmem>>, vector<1x384xf32>
    %29 = vector.broadcast %28 : vector<1x384xf32> to vector<4x384xf32>
    %30 = arith.mulf %27, %29 : vector<4x384xf32>
    %cst_23 = arith.constant dense<0.000000e+00> : vector<4xf32>
    %31 = vector.multi_reduction <add>, %30, %cst_23 [1] : vector<4x384xf32> to vector<4xf32>
    %32 = vector.shape_cast %31 : vector<4xf32> to vector<4x1xf32>
    %33 = arith.mulf %27, %27 : vector<4x384xf32>
    %34 = vector.broadcast %28 : vector<1x384xf32> to vector<4x384xf32>
    %35 = arith.mulf %33, %34 : vector<4x384xf32>
    %cst_24 = arith.constant dense<0.000000e+00> : vector<4xf32>
    %36 = vector.multi_reduction <add>, %35, %cst_24 [1] : vector<4x384xf32> to vector<4xf32>
    %37 = vector.shape_cast %36 : vector<4xf32> to vector<4x1xf32>
    %cst_25 = arith.constant 3.906250e-03 : f32
    %38 = vector.broadcast %cst_25 : f32 to vector<4x1xf32>
    %39 = arith.mulf %32, %38 : vector<4x1xf32>
    %cst_26 = arith.constant 3.906250e-03 : f32
    %40 = vector.broadcast %cst_26 : f32 to vector<4x1xf32>
    %41 = arith.mulf %37, %40 : vector<4x1xf32>
    %42 = arith.mulf %39, %39 : vector<4x1xf32>
    %43 = arith.subf %41, %42 : vector<4x1xf32>
    %cst_27 = arith.constant 0.000000e+00 : f32
    %44 = vector.broadcast %cst_27 : f32 to vector<4x1xf32>
    %45 = arith.maximumf %43, %44 : vector<4x1xf32>
    %46 = vector.broadcast %39 : vector<4x1xf32> to vector<4x384xf32>
    %47 = arith.subf %27, %46 : vector<4x384xf32>
    %cst_28 = arith.constant 9.99999974E-6 : f32
    %48 = vector.broadcast %cst_28 : f32 to vector<4x1xf32>
    %49 = arith.addf %45, %48 : vector<4x1xf32>
    %50 = math.rsqrt %49 : vector<4x1xf32>
    %51 = vector.broadcast %50 : vector<4x1xf32> to vector<4x384xf32>
    %52 = arith.mulf %47, %51 : vector<4x384xf32>
    %cst_29 = arith.constant 0.000000e+00 : f32
    %53 = vector.broadcast %cst_29 : f32 to vector<4x384xf32>
    %54 = arith.maximumf %52, %53 : vector<4x384xf32>
    %c0_30 = arith.constant 0 : index
    %c0_31 = arith.constant 0 : index
    %c0_32 = arith.constant 0 : index
    %55 = vector.load %arg5[%c0_30, %c0_31, %c0_32] : memref<1x4x384xf32, #tpu.memory_space<vmem>>, vector<1x4x384xf32>
    %56 = vector.shape_cast %55 : vector<1x4x384xf32> to vector<4x384xf32>
    %57 = vector.shape_cast %54 : vector<4x384xf32> to vector<1x4x384xf32>
    tpu.vector_store %arg5[%c0_30, %c0_31, %c0_32], %57 {strides = array<i32>} : memref<1x4x384xf32, #tpu.memory_space<vmem>>, vector<1x4x384xf32>,
    return
  }
  func.func @transform_0(%arg0: i32) -> (i32, i32, i32) {
    %c0_i32 = arith.constant 0 : i32
    %c0_i32_0 = arith.constant 0 : i32
    %c0_i32_1 = arith.constant 0 : i32
    return %arg0, %c0_i32, %c0_i32_0 : i32, i32, i32
  }
  func.func @transform_1(%arg0: i32) -> (i32, i32) {
    %c0_i32 = arith.constant 0 : i32
    %c0_i32_0 = arith.constant 0 : i32
    %c0_i32_1 = arith.constant 0 : i32
    return %c0_i32, %c0_i32_0 : i32, i32
  }
  func.func @transform_2(%arg0: i32) -> (i32, i32) {
    %c0_i32 = arith.constant 0 : i32
    %c0_i32_0 = arith.constant 0 : i32
    %c0_i32_1 = arith.constant 0 : i32
    return %c0_i32, %c0_i32_0 : i32, i32
  }
  func.func @transform_3(%arg0: i32) -> (i32, i32) {
    %c0_i32 = arith.constant 0 : i32
    %c0_i32_0 = arith.constant 0 : i32
    %c0_i32_1 = arith.constant 0 : i32
    return %c0_i32, %c0_i32_0 : i32, i32
  }
  func.func @transform_4(%arg0: i32) -> (i32, i32, i32) {
    %c0_i32 = arith.constant 0 : i32
    %c0_i32_0 = arith.constant 0 : i32
    %c0_i32_1 = arith.constant 0 : i32
    return %arg0, %c0_i32, %c0_i32_0 : i32, i32, i32
  }
}

</mosaic_0001>

<bundles_post_ra>
// kernel: tpu_custom_call.1
= control target key start
LH: loop header
LB: loop body
LE: loop exit
PB: predicated region body
PF: predicated region fallthrough
CT: control target
= control target key end

     0   :  { %9 = vsyncpa [#allocation4], 0  ;;  %s1105_s0 = inlined_call_operand.hbm [shape: f32[2,4,384], index: 0, kind: input, shape index: {}]   ;;  %s1106_s1 = inlined_call_operand.vmem [shape: bf16[4,72], index: 1, kind: input, shape index: {}]   ;;  %s1107_s2 = inlined_call_operand.vmem [shape: f32[4,1], index: 2, kind: input, shape index: {}]   ;;  %s1108_s3 = inlined_call_operand.vmem [shape: f32[1,384], index: 3, kind: input, shape index: {}]   ;;  %s1109_s4 = inlined_call_operand.hbm [shape: f32[2,4,384], index: 4, kind: output, shape index: {}]  }
   0x1   :  { %11 = vsyncpa [#allocation4 + $0x1], 0 }
   0x2   :  { %12 = vsyncpa [#allocation5], 0 }
   0x3   :  { %14 = vsyncpa [#allocation5 + $0x1], 0  ;;  %s875_s15 = smov 0   ;;  %s877_s16 = smov 0  }
   0x4   :  { %s879_s17 = smov 0   ;;  %s881_s18 = smov 0  }
   0x5 LB: > { %s896_s19 = sadd.s32 4294967295, %s835_s18   ;;  %s647_s20 = sadd.s32 4294967294, %s835_s18   ;;  %s835_s18 = sphi %s881_s18, %s1125_s18   ;;  %s831_s17 = sphi %s879_s17, %s1124_s17   ;;  %s827_s16 = sphi %s877_s16, %s1123_s16   ;;  %s823_s15 = sphi %s875_s15, %s1122_s15  }
   0x6   : > { %s900_s21 = sadd.s32 1, %s835_s18   ;;  %s27_s22 = sadd.s32 1, %s831_s17 }
   0x7   : > { %s24_s23 = ssub.s32 %s835_s18, %s900_s21  ;;  %p34_p0 = scmp.ne.s32.totalorder %s831_s17, %s827_s16 }
   0x8   : > { %p25_p1 = scmp.eq.s32.totalorder %s24_s23, 0  ;;  %p35_p2 = scmp.eq.s32.totalorder %s835_s18, 0 }
   0x9   : > { %p40_p3 = scmp.ne.s32.totalorder %s827_s16, %s823_s15  ;;  %p41_p4 = scmp.eq.s32.totalorder %s896_s19, 0 }
   0xa   : > { %s912_s24 = scalar_select %p25_p1, %s831_s17, %s27_s22  }
   0xb   : > { %p36_p5 = por %p35_p2, %p34_p0  ;;  %p914_p6 = por %p41_p4, %p40_p3 }
   0xc   : > { %p127_p7 = scmp.eq.s32.totalorder %s896_s19, 1  ;;  %p133_p8 = scmp.eq.s32.totalorder %s647_s20, 1 }
   0xd   : > { %s1112_s25 = scalar_select %p914_p6, 1, 0 }
   0xe   : > { %p694_p10 = scmp.lt.s32.totalorder %s835_s18, 2  ;;  %p921_p11 = por %p127_p7, %p34_p0 }
   0xf   : > { %p925_p12 = por %p133_p8, %p40_p3  ;;  %s162_s28 = sand.u32 1, %s831_s17  }
  0x10   : > { %s1113_s26 = scalar_select %p921_p11, 1, 0 }
  0x11   : > { %s1114_s27 = scalar_select %p925_p12, 1, 0 }
  0x12   : > { %s679_s29 = smul.u32 192, %s835_s18  ;;  %p936_p13 = pnand %p694_p10, %p36_p5 }
  0x13   : > { %s678_s30 = smul.u32 12, %s162_s28  ;;  %s163_s11 = scalar_lea.sflag [#allocation4], %s162_s28 }
  0x14   : > { %s934_s7 = scalar_lea.hbm %s1105_s0, %s679_s29  ;;  %p745_p3 = pneg %p936_p13 }
  0x15   : > { %s166_s9 = scalar_lea.vmem [#allocation3], %s678_s30  ;;  %s743_s12 = scalar_lea.hbm %s934_s7, 192 }
  0x16   : > { %s174_s10 = sshll.u32 %s166_s9, 4  ;;  %p744_p2 = scmp.ne.s32.totalorder %s934_s7, %s743_s12  ;;  %s175_s10 = int_to_ptr.vmem [resolvable:$true] %s174_s10 }
  0x17   : > { %s748_s20 = scalar_lea.hbm %s1105_s0, 384  ;;  %p749_p5 = scmp.lt.s32.totalorder %s934_s7, %s1105_s0 }
  0x18   : > { %p746_p4 = pnand %p745_p3, %p744_p2  ;;  %p750_p8 = scmp.lt.s32.totalorder %s748_s20, %s743_s12 }
  0x1a   : > { %p747_p7 = pneg %p746_p4  ;;  %p751_p10 = por %p750_p8, %p749_p5 }
  0x1c   : > { %p752_p9 = pnand %p751_p10, %p747_p7 }
  0x1e   : > { %755 = shalt.err (!%p752_p9)
}
  0x1f   : > { %s756_s29 = scalar_lea.vmem %s175_s10, 192  ;;  %s837_s28 = smov [#allocation3]  }
  0x20   : > { %p757_p0 = scmp.ne.s32.totalorder %s175_s10, %s756_s29  ;;  %s761_s30 = sshll.u32 %s837_s28, 4  ;;  %s762_s30 = int_to_ptr.vmem [resolvable:$false] %s761_s30 }
  0x21   : > { %s763_s5 = scalar_lea.vmem %s762_s30, 384  ;;  %p764_p2 = scmp.lt.s32.totalorder %s175_s10, %s762_s30 }
  0x22   : > { %p759_p1 = pnand %p757_p0, %p745_p3  ;;  %p765_p4 = scmp.lt.s32.totalorder %s763_s5, %s756_s29 }
  0x24   : > { %p760_p12 = pneg %p759_p1  ;;  %p766_p11 = por %p765_p4, %p764_p2 }
  0x26   : > { %p767_p6 = pnand %p766_p11, %p760_p12 }
  0x28   : > { %770 = shalt.err (!%p767_p6)
}
  0x29   : > { %689 = dma.hbm_to_vmem [thread:$0]  (!%p936_p13), %s934_s7, 192, %s175_s10, %s163_s11  }
  0x2a   : > { %p1116_p9 = scmp.lt.s32.totalorder %s835_s18, 3  ;;  %p1117_p7 = scmp.ge.s32.totalorder %s835_s18, 1 }
  0x2c   : > { %p180_p5 = pnand %p1117_p7, %p1116_p9 }
  0x2d   : > { %s961_s6 = sand.u32 (!%p180_p5), 1, %s827_s16   ;;  %p1118_p6 = scmp.ne.s32.totalorder (!%p180_p5), %s1112_s25, 0 }
  0x2e   : > { %183 = sbr.rel (%p180_p5) target bundleno = 613 (0x265), region = 36  ;;  %s186_s12 = scalar_lea.sflag (!%p180_p5), [#allocation4], %s961_s6 }
  0x2f   : > { %s680_s9 = smul.u32 (!%p180_p5), 12, %s961_s6 }
  0x31   : > { %s967_s13 = scalar_lea.vmem (!%p180_p5), [#allocation3], %s680_s9 }
  0x33   : > { %814 = dma.done.wait (%p1118_p6), %s186_s12, 192  }
  0x34   : > { %816 = vsyncadd (%p1118_p6), %s186_s12, 4294967104  ;;  %v838_v0 = vmov 0.0   ;;  %v216_v1 = vld [vmem:[%s967_s13 + $0x8] sm:$0xf]  ;;  %v215_v2 = vld [vmem:[%s967_s13] sm:$0xff]  ;;  %s839_s25 = smov 90   ;;  %v256_v6 = vlaneseq }
  0x35   : > { %243 = vst [vmem:[#allocation2 + $0x68] sm:$0xff] %v838_v0  ;;  %217 = vst [vmem:[#allocation2 + $0xb0] sm:$0xff] %v838_v0  ;;  %664 = vmatprep.subr.bf16.mxu1 %v838_v0  ;;  %347 = vrot.lane.b32.xlu1 %v216_v1, %s839_s25  ;;  %v245_v3 = vcombine.high %v215_v2, %v215_v2  ;;  %s840_s7 = smov 92   ;;  %s841_s8 = smov 91   ;;  %vm847_vm0 = vmmov 0   ;;  %v848_v4 = vmov 0  }
  0x36   : > { %218 = vst [vmem:[#allocation2] sm:$0xff] %v838_v0  ;;  %219 = vst [vmem:[#allocation2 + $0x10] sm:$0xff] %v838_v0  ;;  %343 = vrot.lane.b32.xlu0 %v215_v2, %s839_s25  ;;  %s842_s10 = smov 109   ;;  %s843_s11 = smov 108   ;;  %674 = vmatprep.mubr.msk.bf16.mxu1 %vm847_vm0, %v838_v0  ;;  %v399_v5 = vld [vmem:[%s1107_s2] sm:$0xf] }
  0x37   : > { %220 = vst [vmem:[#allocation2 + $0x48] sm:$0xff] %v838_v0  ;;  %221 = vst [vmem:[#allocation2 + $0x60] sm:$0xff] %v838_v0  ;;  %s844_s14 = smov 126   ;;  %s845_s20 = smov 110   ;;  %451 = vmatprep.mubr.bf16.mxu0 %v848_v4  ;;  %739 = vset.pattern.permute.xlu0 %v848_v4  ;;  %v1008_v7 = vand.u32 127, %v256_v6  ;;  %vm409_vm3 = vcmask 1043456  }
  0x38   : > { %222 = vst [vmem:[#allocation2 + $0x28] sm:$0xff] %v838_v0  ;;  %223 = vst [vmem:[#allocation2 + $0x40] sm:$0xff] %v838_v0  ;;  %s846_s22 = smov 127   ;;  %vm405_vm10 = vcmask 588800   ;;  %s681_s13 = smul.u32 192, %s896_s19 }
  0x39   : > { %224 = vst [vmem:[#allocation2 + $0x78] sm:$0xff] %v838_v0  ;;  %225 = vst [vmem:[#allocation2 + $0x80] sm:$0xff] %v838_v0  ;;  %319 = vrot.lane.b32.xlu1 %v245_v3, %s840_s7  ;;  %vm349_vm1 = vcmp.lt.s32.totalorder %v1008_v7, 90  ;;  %vm323_vm2 = vcmp.lt.s32.totalorder %v1008_v7, 92  ;;  %vm336_vm4 = vcmp.lt.s32.totalorder %v1008_v7, 91  ;;  %vm297_vm5 = vcmp.lt.s32.totalorder %v1008_v7, 109 }
  0x3a   : > { %226 = vst [vmem:[#allocation2 + $0xa8] sm:$0xff] %v838_v0  ;;  %227 = vst [vmem:[#allocation2 + $0x50] sm:$0xff] %v838_v0  ;;  %321 = vrot.lane.b32.xlu0 %v216_v1, %s840_s7  ;;  %vm310_vm6 = vcmp.lt.s32.totalorder %v1008_v7, 108  ;;  %vm271_vm7 = vcmp.lt.s32.totalorder %v1008_v7, 126  ;;  %vm284_vm8 = vcmp.lt.s32.totalorder %v1008_v7, 110  ;;  %vm258_vm9 = vcmp.lt.s32.totalorder %v1008_v7, 127 }
  0x3b   : > { %228 = vst [vmem:[#allocation2 + $0x30] sm:$0xff] %v838_v0  ;;  %229 = vst [vmem:[#allocation2 + $0x88] sm:$0xff] %v838_v0  ;;  %p1119_p12 = scmp.ne.s32.totalorder %s1113_s26, 0  ;;  %s849_s19 = smov [#allocation6]  }
  0x3c   : > { %230 = vst [vmem:[#allocation2 + $0x70] sm:$0xff] %v838_v0  ;;  %231 = vst [vmem:[#allocation2 + $0x8] sm:$0xff] %v838_v0 }
  0x3d   : > { %232 = vst [vmem:[#allocation2 + $0x38] sm:$0xff] %v838_v0  ;;  %233 = vst [vmem:[#allocation2 + $0x20] sm:$0xff] %v838_v0  ;;  %332 = vrot.lane.b32.xlu1 %v245_v3, %s841_s8 }
  0x3e   : > { %234 = vst [vmem:[#allocation2 + $0xb8] sm:$0xff] %v838_v0  ;;  %235 = vst [vmem:[#allocation2 + $0x58] sm:$0xff] %v838_v0  ;;  %345 = vrot.lane.b32.xlu0 %v245_v3, %s839_s25  ;;  %s213_s25 = scalar_lea.vmem [#allocation6], %s680_s9  ;;  %s775_s9 = sshll.u32 %s849_s19, 4  ;;  %s776_s9 = int_to_ptr.vmem [resolvable:$false] %s775_s9 }
  0x3f   : > { %236 = vst [vmem:[#allocation2 + $0xc8] sm:$0xff] %v838_v0  ;;  %237 = vst [vmem:[#allocation2 + $0xa0] sm:$0xff] %v838_v0 }
  0x40   : > { %238 = vst [vmem:[#allocation2 + $0x90] sm:$0xff] %v838_v0  ;;  %239 = vst [vmem:[#allocation2 + $0x98] sm:$0xff] %v838_v0 }
  0x41   : > { %240 = vst [vmem:[#allocation2 + $0x18] sm:$0xff] %v838_v0  ;;  %241 = vst [vmem:[#allocation2 + $0xd0] sm:$0xff] %v838_v0  ;;  %317 = vrot.lane.b32.xlu1 %v215_v2, %s840_s7  ;;  %s577_s7 = sshll.u32 %s213_s25, 4  ;;  %s578_s7 = int_to_ptr.vmem [resolvable:$true] %s577_s7 }
  0x42   : > { %242 = vst [vmem:[#allocation2 + $0xc0] sm:$0xff] %v838_v0  ;;  %247 = vst [vmem:[#allocation2 + $0xb0] sm:$0xf] %v215_v2  ;;  %334 = vrot.lane.b32.xlu0 %v216_v1, %s841_s8  ;;  %p778_p1 = scmp.lt.s32.totalorder %s578_s7, %s776_s9 }
  0x43   : > { %249 = vst [vmem:[#allocation2 + $0x10] sm:$0xf] %v216_v1  ;;  %248 = vst [vmem:[#allocation2] sm:$0xf] %v245_v3 }
  0x45   : > { %293 = vrot.lane.b32.xlu1 %v245_v3, %s842_s10 }
  0x46   : > { %330 = vrot.lane.b32.xlu0 %v215_v2, %s841_s8 }
  0x49   : > { %306 = vrot.lane.b32.xlu1 %v245_v3, %s843_s11 }
  0x4a   : > { %295 = vrot.lane.b32.xlu0 %v216_v1, %s842_s10  ;;  %v359_v7 = vld [vmem:[#allocation2 + $0x10] sm:$0xff] }
  0x4d   : > { %291 = vrot.lane.b32.xlu1 %v215_v2, %s842_s10 }
  0x4e   : > { %308 = vrot.lane.b32.xlu0 %v216_v1, %s843_s11 }
  0x51   : > { %267 = vrot.lane.b32.xlu1 %v245_v3, %s844_s14 }
  0x52   : > { %304 = vrot.lane.b32.xlu0 %v215_v2, %s843_s11  ;;  %s575_s11 = scalar_lea.hbm %s1109_s4, %s681_s13 }
  0x55   : > { %280 = vrot.lane.b32.xlu1 %v245_v3, %s845_s20 }
  0x56   : > { %269 = vrot.lane.b32.xlu0 %v216_v1, %s844_s14 }
  0x59   : > { %265 = vrot.lane.b32.xlu1 %v215_v2, %s844_s14  ;;  %s563_s14 = scalar_lea.sflag [#allocation5], %s961_s6 }
  0x5a   : > { %282 = vrot.lane.b32.xlu0 %v216_v1, %s845_s20 }
  0x5d   : > { %252 = vrot.lane.b32.xlu1 %v245_v3, %s846_s22 }
  0x5e   : > { %278 = vrot.lane.b32.xlu0 %v215_v2, %s845_s20  ;;  %s771_s20 = scalar_lea.vmem %s578_s7, 192 }
  0x5f   : > { %p772_p11 = scmp.ne.s32.totalorder %s578_s7, %s771_s20 }
  0x61   : > { %250 = vrot.lane.b32.xlu1 %v215_v2, %s846_s22  ;;  %p773_p13 = pnand %p772_p11, %p1119_p12 }
  0x62   : > { %254 = vrot.lane.b32.xlu0 %v216_v1, %s846_s22  ;;  %s777_s22 = scalar_lea.vmem %s776_s9, 384 }
  0x63   : > { %p774_p0 = pneg %p773_p13  ;;  %p779_p3 = scmp.lt.s32.totalorder %s777_s22, %s771_s20 }
  0x65   : > { %p780_p8 = por %p779_p3, %p778_p1 }
  0x66   : > { %402 = vperm.xlu0 %739, %v399_v5  }
  0x67   : > { %p781_p10 = pnand %p780_p8, %p774_p0 }
  0xa7   : > { %v348_v8 = vpop.permute.xlu1 %347 }
  0xa8   : > { %v344_v9 = vpop.permute.xlu0 %343 }
  0xa9   : > { %v352_v10 = vsel %vm349_vm1, %v348_v8, %v344_v9 }
  0xaa   : > { %355 = vst [vmem:[#allocation2 + $0x68] sm:$0xf] %v352_v10 }
  0xab   : > { %v320_v12 = vpop.permute.xlu1 %319 }
  0xac   : > { %v322_v11 = vpop.permute.xlu0 %321 }
  0xad   : > { %v324_v13 = vsel %vm323_vm2, %v320_v12, %v322_v11 }
  0xae   : > { %328 = vst [vmem:[#allocation2 + $0xc8] sm:$0xf] %v324_v13 }
  0xaf   : > { %v333_v14 = vpop.permute.xlu1 %332 }
  0xb0   : > { %v346_v15 = vpop.permute.xlu0 %345 }
  0xb1   : > { %v350_v16 = vsel %vm349_vm1, %v346_v15, %v348_v8  ;;  %v351_v17 = vsel %vm349_vm1, %v344_v9, %v346_v15  ;;  %v383_v18 = vld [vmem:[#allocation2 + $0x68] sm:$0xff] }
  0xb2   : > { %353 = vst [vmem:[#allocation2 + $0xd0] sm:$0xf] %v351_v17  ;;  %354 = vst [vmem:[#allocation2 + $0xc0] sm:$0xf] %v350_v16  ;;  %v398_v19 = vpack.c.bf16 %v383_v18, %v383_v18 }
  0xb3   : > { %v318_v20 = vpop.permute.xlu1 %317 }
  0xb4   : > { %v335_v21 = vpop.permute.xlu0 %334  ;;  %v417_v22 = vsel %vm409_vm3, %v398_v19, 0  ;;  %v325_v23 = vsel %vm323_vm2, %v318_v20, %v320_v12  ;;  %v326_v24 = vsel %vm323_vm2, %v322_v11, %v318_v20 }
  0xb5   : > { %v337_v25 = vsel %vm336_vm4, %v333_v14, %v335_v21  ;;  %665 = vmatpush3.bf16.msra.mxu1 %v417_v22  ;;  %327 = vst [vmem:[#allocation2 + $0x58] sm:$0xf] %v325_v23  ;;  %329 = vst [vmem:[#allocation2 + $0xa0] sm:$0xf] %v326_v24  ;;  %v376_v38 = vld [vmem:[#allocation2 + $0xc8] sm:$0xff] }
  0xb6   : > { %341 = vst [vmem:[#allocation2 + $0x98] sm:$0xf] %v337_v25  ;;  %666 = vmatprep.subr.bf16.mxu1 %v838_v0 }
  0xb7   : > { %v294_v26 = vpop.permute.xlu1 %293 }
  0xb8   : > { %v331_v27 = vpop.permute.xlu0 %330 }
  0xb9   : > { %v338_v28 = vsel %vm336_vm4, %v331_v27, %v333_v14  ;;  %v339_v29 = vsel %vm336_vm4, %v335_v21, %v331_v27  ;;  %v382_v30 = vld [vmem:[#allocation2 + $0xc0] sm:$0xff]  ;;  %v381_v31 = vld [vmem:[#allocation2 + $0xd0] sm:$0xff] }
  0xba   : > { %340 = vst [vmem:[#allocation2 + $0x90] sm:$0xf] %v338_v28  ;;  %342 = vst [vmem:[#allocation2 + $0x18] sm:$0xf] %v339_v29  ;;  %v397_v32 = vpack.c.bf16 %v382_v30, %v382_v30  ;;  %v396_v33 = vpack.c.bf16 %v381_v31, %v381_v31  ;;  %v358_v30 = vld [vmem:[#allocation2] sm:$0xff]  ;;  %v357_v31 = vld [vmem:[#allocation2 + $0xb0] sm:$0xff] }
  0xbb   : > { %v307_v34 = vpop.permute.xlu1 %306 }
  0xbc   : > { %652 = vmatprep.subr.msk.bf16.mxu0 %vm409_vm3, %v397_v32  ;;  %v296_v35 = vpop.permute.xlu0 %295  ;;  %v411_v36 = vsel %vm409_vm3, %v396_v33, 0  ;;  %v375_v43 = vld [vmem:[#allocation2 + $0x58] sm:$0xff]  ;;  %v377_v48 = vld [vmem:[#allocation2 + $0xa0] sm:$0xff] }
  0xbd   : > { %v298_v37 = vsel %vm297_vm5, %v294_v26, %v296_v35  ;;  %426 = vmatpush1.bf16.msra.mxu0 %v411_v36  ;;  %v379_v39 = vld [vmem:[#allocation2 + $0x98] sm:$0xff] }
  0xbe   : > { %302 = vst [vmem:[#allocation2 + $0x70] sm:$0xf] %v298_v37  ;;  %v394_v40 = vpack.c.bf16 %v379_v39, %v376_v38  ;;  %v356_v38 = vld [vmem:[%s1106_s1] sm:$0x3]  ;;  %v503_v39 = vshrl.u32 %v256_v6, 7 }
  0xbf   : > { %v292_v41 = vpop.permute.xlu1 %291 }
  0xc0   : > { %427 = vmatprep.subr.bf16.mxu0 %v394_v40  ;;  %v309_v42 = vpop.permute.xlu0 %308  ;;  %v299_v44 = vsel %vm297_vm5, %v292_v41, %v294_v26  ;;  %v300_v45 = vsel %vm297_vm5, %v296_v35, %v292_v41  ;;  %v504_v40 = vsub.s32 0, %v503_v39  ;;  %v508_v41 = vsub.s32 1, %v503_v39 }
  0xc1   : > { %v311_v46 = vsel %vm310_vm6, %v307_v34, %v309_v42  ;;  %v378_v47 = vld [vmem:[#allocation2 + $0x90] sm:$0xff]  ;;  %v380_v49 = vld [vmem:[#allocation2 + $0x18] sm:$0xff]  ;;  %301 = vst [vmem:[#allocation2 + $0x88] sm:$0xf] %v299_v44  ;;  %303 = vst [vmem:[#allocation2 + $0x8] sm:$0xf] %v300_v45 }
  0xc2   : > { %315 = vst [vmem:[#allocation2 + $0x20] sm:$0xf] %v311_v46  ;;  %v393_v50 = vpack.c.bf16 %v378_v47, %v375_v43  ;;  %v395_v51 = vpack.c.bf16 %v380_v49, %v377_v48 }
  0xc3   : > { %v268_v52 = vpop.permute.xlu1 %267 }
  0xc4   : > { %428 = vmatpush1.bf16.msra.mxu0 %v393_v50  ;;  %667 = vmatpush3.bf16.msra.mxu1 %v395_v51  ;;  %v305_v53 = vpop.permute.xlu0 %304 }
  0xc5   : > { %v312_v54 = vsel %vm310_vm6, %v305_v53, %v307_v34  ;;  %v313_v55 = vsel %vm310_vm6, %v309_v42, %v305_v53  ;;  %668 = vmatprep.subr.bf16.mxu1 %v838_v0  ;;  %v370_v59 = vld [vmem:[#allocation2 + $0x70] sm:$0xff]  ;;  %v512_v42 = vsub.s32 2, %v503_v39 }
  0xc6   : > { %314 = vst [vmem:[#allocation2 + $0x38] sm:$0xf] %v312_v54  ;;  %316 = vst [vmem:[#allocation2 + $0xb8] sm:$0xf] %v313_v55 }
  0xc7   : > { %v281_v56 = vpop.permute.xlu1 %280 }
  0xc8   : > { %v270_v57 = vpop.permute.xlu0 %269  ;;  %v369_v1 = vld [vmem:[#allocation2 + $0x88] sm:$0xff] }
  0xc9   : > { %v272_v58 = vsel %vm271_vm7, %v268_v52, %v270_v57  ;;  %v373_v60 = vld [vmem:[#allocation2 + $0x20] sm:$0xff]  ;;  %v371_v8 = vld [vmem:[#allocation2 + $0x8] sm:$0xff] }
  0xca   : > { %276 = vst [vmem:[#allocation2 + $0x78] sm:$0xf] %v272_v58  ;;  %v391_v61 = vpack.c.bf16 %v373_v60, %v370_v59 }
  0xcb   : > { %v266_v62 = vpop.permute.xlu1 %265 }
  0xcc   : > { %429 = vmatprep.subr.bf16.mxu0 %v391_v61  ;;  %v283_v63 = vpop.permute.xlu0 %282  ;;  %v273_v2 = vsel %vm271_vm7, %v266_v62, %v268_v52  ;;  %v274_v3 = vsel %vm271_vm7, %v270_v57, %v266_v62 }
  0xcd   : > { %v285_v4 = vsel %vm284_vm8, %v281_v56, %v283_v63  ;;  %v372_v5 = vld [vmem:[#allocation2 + $0x38] sm:$0xff]  ;;  %275 = vst [vmem:[#allocation2 + $0x40] sm:$0xf] %v273_v2  ;;  %277 = vst [vmem:[#allocation2 + $0x80] sm:$0xf] %v274_v3 }
  0xce   : > { %v374_v9 = vld [vmem:[#allocation2 + $0xb8] sm:$0xff]  ;;  %289 = vst [vmem:[#allocation2 + $0x50] sm:$0xf] %v285_v4  ;;  %v390_v10 = vpack.c.bf16 %v372_v5, %v369_v1 }
  0xcf   : > { %v392_v11 = vpack.c.bf16 %v374_v9, %v371_v8  ;;  %v253_v12 = vpop.permute.xlu1 %252 }
  0xd0   : > { %430 = vmatpush1.bf16.msra.mxu0 %v390_v10  ;;  %v279_v13 = vpop.permute.xlu0 %278 }
  0xd1   : > { %669 = vmatpush3.bf16.msra.mxu1 %v392_v11  ;;  %v286_v14 = vsel %vm284_vm8, %v279_v13, %v281_v56  ;;  %v287_v15 = vsel %vm284_vm8, %v283_v63, %v279_v13  ;;  %v364_v21 = vld [vmem:[#allocation2 + $0x78] sm:$0xff] }
  0xd2   : > { %670 = vmatprep.subr.bf16.mxu1 %v838_v0  ;;  %288 = vst [vmem:[#allocation2 + $0xa8] sm:$0xf] %v286_v14  ;;  %290 = vst [vmem:[#allocation2 + $0x30] sm:$0xf] %v287_v15 }
  0xd3   : > { %v251_v16 = vpop.permute.xlu1 %250 }
  0xd4   : > { %v255_v17 = vpop.permute.xlu0 %254  ;;  %v260_v18 = vsel %vm258_vm9, %v251_v16, %v253_v12  ;;  %v363_v24 = vld [vmem:[#allocation2 + $0x40] sm:$0xff] }
  0xd5   : > { %v259_v19 = vsel %vm258_vm9, %v253_v12, %v255_v17  ;;  %v261_v20 = vsel %vm258_vm9, %v255_v17, %v251_v16  ;;  %v367_v22 = vld [vmem:[#allocation2 + $0x50] sm:$0xff]  ;;  %262 = vst [vmem:[#allocation2 + $0x48] sm:$0xf] %v260_v18  ;;  %v365_v26 = vld [vmem:[#allocation2 + $0x80] sm:$0xff] }
  0xd6   : > { %263 = vst [vmem:[#allocation2 + $0x60] sm:$0xf] %v259_v19  ;;  %264 = vst [vmem:[#allocation2 + $0x28] sm:$0xf] %v261_v20  ;;  %v388_v23 = vpack.c.bf16 %v367_v22, %v364_v21 }
  0xd8   : > { %431 = vmatprep.subr.bf16.mxu0 %v388_v23 }
  0xd9   : > { %v366_v25 = vld [vmem:[#allocation2 + $0xa8] sm:$0xff]  ;;  %v368_v27 = vld [vmem:[#allocation2 + $0x30] sm:$0xff] }
  0xda   : > { %v387_v28 = vpack.c.bf16 %v366_v25, %v363_v24  ;;  %v389_v29 = vpack.c.bf16 %v368_v27, %v365_v26 }
  0xdc   : > { %432 = vmatpush1.bf16.msra.mxu0 %v387_v28  ;;  %671 = vmatpush3.bf16.msra.mxu1 %v389_v29  ;;  %v360_v34 = vld [vmem:[#allocation2 + $0x48] sm:$0xff] }
  0xdd   : > { %672 = vmatprep.subr.bf16.mxu1 %v838_v0  ;;  %v361_v32 = vld [vmem:[#allocation2 + $0x60] sm:$0xff]  ;;  %v362_v33 = vld [vmem:[#allocation2 + $0x28] sm:$0xff]  ;;  %v384_v37 = vpack.c.bf16 %v360_v34, %v357_v31 }
  0xde   : > { %v385_v35 = vpack.c.bf16 %v361_v32, %v358_v30  ;;  %v386_v36 = vpack.c.bf16 %v362_v33, %v359_v7  ;;  %v500_v0 = vld [vmem:[%s1108_s3] sm:$0x7] }
  0xdf   : > { %v505_v45 = vrot.slane %v500_v0, %v504_v40  ;;  %v509_v50 = vrot.slane %v500_v0, %v508_v41  ;;  %v513_v51 = vrot.slane %v500_v0, %v512_v42 }
  0xe0   : > { %433 = vmatprep.subr.bf16.mxu0 %v385_v35  ;;  %673 = vmatpush3.bf16.msra.mxu1 %v386_v36 }
  0xe1   : > { %434 = vmatpush1.bf16.msra.mxu0 %v384_v37  ;;  %v403_v43 = vpop.permute.xlu0 %402 }
  0xe3   : > { %675 = vmatmul.mubr.msk.bf16.vlgmr.msra.gmra.mxu1 %vm405_vm10, %v356_v38 }
  0xe4   : > { %653 = vmatmul.mubr.msk.bf16.vlgmr.msra.gmra.mxu0 %vm405_vm10, %v356_v38 }
 0x1a3   : > { %v494_v44 = vpop.f32.mrf.mxu1 }
 0x1a4   : > { %v495_v46 = vadd.f32 %v494_v44, %v403_v43  ;;  %v453_v47 = vpop.f32.mrf.mxu0 }
 0x1a5   : > { %v454_v48 = vadd.f32 %v453_v47, %v403_v43  ;;  %v676_v49 = vpop.f32.mrf.mxu1 }
 0x1a6   : > { %v455_v52 = vpop.f32.mrf.mxu0  ;;  %v529_v56 = vmul.f32 %v495_v46, %v495_v46  ;;  %v519_v61 = vmul.f32 %v513_v51, %v495_v46 }
 0x1a7   : > { %v517_v53 = vmul.f32 %v505_v45, %v454_v48  ;;  %v527_v54 = vmul.f32 %v454_v48, %v454_v48  ;;  %v456_v6 = vadd.f32 %v455_v52, %v403_v43  ;;  %v497_v55 = vpop.f32.mrf.mxu1 }
 0x1a8   : > { %v457_v57 = vpop.f32.mrf.mxu0  ;;  %v532_v4 = vmul.f32 %v529_v56, %v513_v51  ;;  %v523_v8 = vsel %vm409_vm3, %v519_v61, 0.0 }
 0x1a9   : > { %v518_v58 = vmul.f32 %v509_v50, %v456_v6  ;;  %v528_v59 = vmul.f32 %v456_v6, %v456_v6  ;;  %v677_v60 = vpop.f32.mrf.mxu1  ;;  %v530_v62 = vmul.f32 %v527_v54, %v505_v45  ;;  %v520_v1 = vsel %vm409_vm3, %v517_v53, 0.0 }
 0x1aa   : > { %v458_v63 = vpop.f32.mrf.mxu0  ;;  %v536_v13 = vsel %vm409_vm3, %v532_v4, 0.0 }
 0x1ab   : > { %v521_v2 = vsel %vm409_vm3, %v518_v58, 0.0  ;;  %v531_v3 = vmul.f32 %v528_v59, %v509_v50  ;;  %v533_v9 = vsel %vm409_vm3, %v530_v62, 0.0 }
 0x1ac   : > { %v522_v5 = vadd.f32 %v521_v2, %v520_v1 }
 0x1ad   : > { %v534_v10 = vsel %vm409_vm3, %v531_v3, 0.0 }
 0x1ae   : > { %v524_v11 = vadd.f32 %v523_v8, %v522_v5  ;;  %v535_v12 = vadd.f32 %v534_v10, %v533_v9 }
 0x1b0   : > { %525 = vadd.xlane.f32.xlu1 %v524_v11  ;;  %v537_v14 = vadd.f32 %v536_v13, %v535_v12 }
 0x1b2   : > { %538 = vadd.xlane.f32.xlu0 %v537_v14 }
 0x239   : > { %v526_v15 = vpop.xlane.xlu1 %525 }
 0x23a   : > { %v540_v16 = vmul.f32 0.00390625, %v526_v15 }
 0x23b   : > { %v539_v17 = vpop.xlane.xlu0 %538 }
 0x23c   : > { %v541_v18 = vmul.f32 0.00390625, %v539_v17  ;;  %v542_v19 = vmul.f32 %v540_v16, %v540_v16  ;;  %v545_v23 = vsub.f32 %v454_v48, %v540_v16  ;;  %v546_v24 = vsub.f32 %v456_v6, %v540_v16 }
 0x23d   : > { %v547_v25 = vsub.f32 %v495_v46, %v540_v16 }
 0x23e   : > { %v543_v20 = vsub.f32 %v541_v18, %v542_v19 }
 0x240   : > { %v544_v21 = vmax.f32 %v543_v20, 0.0 }
 0x242   : > { %v548_v22 = vadd.f32 1e-05, %v544_v21 }
 0x244   : > { %741 = vrsqrt.f32 %v548_v22 }
 0x251   : > { %v742_v26 = vpop.eup %741 }
 0x252   : > { %v550_v27 = vmul.f32 %v742_v26, %v545_v23  ;;  %v551_v28 = vmul.f32 %v742_v26, %v546_v24  ;;  %v552_v29 = vmul.f32 %v742_v26, %v547_v25 }
 0x254   : > { %v553_v30 = vmax.f32 %v550_v27, 0.0  ;;  %v554_v7 = vmax.f32 %v551_v28, 0.0  ;;  %v555_v31 = vmax.f32 %v552_v29, 0.0 }
 0x256   : > { %v558_v32 = vcombine.low %v553_v30, %v554_v7  ;;  %561 = vst [vmem:[%s213_s25 + $0x8] sm:$0xf] %v555_v31 }
 0x258   : > { %560 = vst [vmem:[%s213_s25] sm:$0xff] %v558_v32 }
 0x259   : > { %784 = shalt.err (!%p781_p10)
}
 0x25a   : > { %s785_s23 = scalar_lea.hbm %s575_s11, 192  ;;  %s789_s28 = scalar_lea.hbm %s1109_s4, 384 }
 0x25b   : > { %p786_p2 = scmp.ne.s32.totalorder %s575_s11, %s785_s23  ;;  %p790_p7 = scmp.lt.s32.totalorder %s575_s11, %s1109_s4 }
 0x25c   : > { %p791_p5 = scmp.lt.s32.totalorder %s789_s28, %s785_s23 }
 0x25d   : > { %p787_p4 = pnand %p786_p2, %p1119_p12 }
 0x25e   : > { %p792_p6 = por %p791_p5, %p790_p7 }
 0x25f   : > { %p788_p9 = pneg %p787_p4 }
 0x261   : > { %p793_p11 = pnand %p792_p6, %p788_p9 }
 0x263   : > { %796 = shalt.err (!%p793_p11)
}
 0x264   : > { %684 = dma.vmem_to_hbm [thread:$0]  (%p1119_p12), %s578_s7, 192, %s575_s11, %s563_s14  }
 0x265 PF: > { %s589_s12 = sand.u32 1, %s823_s15   ;;  %p1120_p13 = scmp.ne.s32.totalorder %s1114_s27, 0 }
 0x266   : > { %p1121_p0 = scmp.ge.s32.totalorder %s835_s18, 2  ;;  %s590_s13 = scalar_lea.sflag [#allocation5], %s589_s12 }
 0x268   : > { %p691_p1 = pnand %p1121_p0, %p1120_p13 }
 0x26a   : > { %p692_p3 = pneg %p691_p1 }
 0x26c   : > { %818 = dma.done.wait (%p692_p3), %s590_s13, 192  }
 0x26d   : > { %820 = vsyncadd (%p692_p3), %s590_s13, 4294967104  ;;  %p17_p8 = scmp.ge.s32.totalorder %s900_s21, 4   ;;  %s1122_s15 = smov %s827_s16 }
 0x26e   : > { %s1123_s16 = smov %s831_s17  ;;  %s1124_s17 = smov %s912_s24 }
 0x26f   : > { %s1125_s18 = smov %s900_s21  ;;  %19 = sbr.rel (!%p17_p8) target bundleno = 5 (0x5), region = 81 }
 0x274   :  { %595 = vsyncpa [#allocation4], 1 }
 0x275   :  { %597 = vsyncpa [#allocation4 + $0x1], 1 }
 0x276   :  { %598 = vsyncpa [#allocation5], 1 }
 0x277   :  { %600 = vsyncpa [#allocation5 + $0x1], 1 }

</bundles_post_ra>
